<compile_context>
chip_gen: v5e
topology: v5e:2x2
jax: 0.10.0
libtpu: 0.0.40
codegen_flags: <defaults>
</compile_context>

<pallas_src>
import functools

import jax
import jax.numpy as jnp
from jax import lax
from jax.experimental import pallas as pl
from jax.experimental.pallas import tpu as pltpu


def basic_block_kernel(x_ref, scale_ref, bias_ref, wg_ref, mask_ref, o_ref,
                       pad_ref, rhs_ref, *, H, W):
    # x_ref:     (B_blk, Cin, H*W)       input block (native dtype), lane-dense
    # scale_ref: (Cin, 1) f32            folded BN scale  gamma / sqrt(var+eps)
    # bias_ref:  (Cin, 1) f32            folded BN bias   beta - mean*scale
    # wg_ref:    (Cout, 9*Cin) bf16      conv weight, tap-major grouped K
    # mask_ref:  (2, H*W) f32            row0: col != 0, row1: col != W-1 (0/1)
    # o_ref:     (B_blk, Cin+Cout, H*W)  fused output [x ; conv(relu(bn(x)))]
    # pad_ref:   VMEM (Cin, (H+2)*W+2) f32       flat H-padded activation buffer
    # rhs_ref:   VMEM (9*Cin, B_blk*H*W) bf16    stacked tap windows (MXU RHS)
    B_blk, Cin, HW = x_ref.shape
    Cout = wg_ref.shape[0]

    # Zero the halo once per grid step (top/bottom rows + 1-elem margins).
    # Safe under TensorCore-sharded scratch: every invocation re-establishes
    # its own halo before use.
    pad_ref[:, 0:W + 1] = jnp.zeros((Cin, W + 1), jnp.float32)
    pad_ref[:, (H + 1) * W + 1:(H + 2) * W + 2] = jnp.zeros((Cin, W + 1),
                                                            jnp.float32)

    not_first_col = mask_ref[0:1, :]      # (1, HW) multiplicative 0/1
    not_last_col = mask_ref[1:2, :]

    for b in range(B_blk):                # static unroll over the batch block
        x = x_ref[b]                      # (Cin, HW)

        # ---- fused concat passthrough: out[:, :Cin] = x (lane-dense store)
        o_ref[b, 0:Cin, :] = x.astype(o_ref.dtype)

        # ---- BatchNorm (eval, folded) + ReLU on the VPU, f32
        a = jnp.maximum(x.astype(jnp.float32) * scale_ref[...] + bias_ref[...],
                        0.0)                                   # (Cin, HW)
        pad_ref[:, W + 1:(H + 1) * W + 1] = a                  # interior rows

        # ---- build the aligned bf16 stacked RHS: rows [t*Cin:(t+1)*Cin] hold
        # tap t = ky*3+kx; dx=+-1 wraparound lanes are zeroed via the masks
        # (exact 0/1 multiply).
        for ky in range(3):
            for kx in range(3):
                t = ky * 3 + kx
                start = ky * W + kx                            # static offset
                win = pad_ref[:, start:start + HW]             # (Cin, HW) f32
                if kx == 0:
                    win = win * not_first_col
                elif kx == 2:
                    win = win * not_last_col
                rhs_ref[t * Cin:(t + 1) * Cin, b * HW:(b + 1) * HW] = (
                    win.astype(jnp.bfloat16))

    # ---- single deep-K bf16 MXU matmul for the whole batch block,
    # f32 accumulate: (Cout, 9*Cin) @ (9*Cin, B_blk*HW)
    res = jnp.dot(wg_ref[...], rhs_ref[...],
                  preferred_element_type=jnp.float32)

    # ---- fused concat: out[:, Cin:] = conv result (lane-dense stores)
    for b in range(B_blk):
        o_ref[b, Cin:Cin + Cout, :] = res[:, b * HW:(b + 1) * HW].astype(
            o_ref.dtype)


def _pick_batch_block(N, Cin, Cout, HW, in_itemsize, out_itemsize,
                      max_bytes=4 << 20):
    """Largest divisor of N whose per-step in/out blocks + RHS scratch fit budget."""
    best = 1
    for cand in range(1, N + 1):
        if N % cand:
            continue
        blk = (cand * Cin * HW * in_itemsize                 # x block
               + cand * (Cin + Cout) * HW * out_itemsize     # out block
               + 9 * Cin * cand * HW * 2)                    # bf16 stacked RHS
        if blk <= max_bytes:
            best = cand
    return best


def basic_block(x_nchw, gamma, beta, running_mean, running_var, conv_w,
                eps=1e-5, drop_rate=0.0):
    """Forward pass of BasicBlock. Returns NCHW tensor with Cin+Cout channels."""
    if drop_rate > 0.0:
        # TODO(synk): implement dropout via pltpu.prng_seed/prng_random_bits.
        raise NotImplementedError("drop_rate > 0 not implemented")

    N, Cin, H, W = x_nchw.shape
    Cout = conv_w.shape[0]
    HW = H * W
    out_dtype = x_nchw.dtype

    # Free reshape only (contiguous); x stays in its native dtype (cast in-kernel).
    x_flat = x_nchw.reshape(N, Cin, HW)

    # Folded eval-mode BatchNorm parameters (f32).
    scale_vec = gamma.astype(jnp.float32) / jnp.sqrt(
        running_var.astype(jnp.float32) + eps)
    bias_vec = beta.astype(jnp.float32) - running_mean.astype(jnp.float32) * scale_vec
    scale2 = scale_vec.reshape(Cin, 1)
    bias2 = bias_vec.reshape(Cin, 1)

    # Grouped-K bf16 weight: (Cout, Cin, 3, 3) OIHW -> (Cout, ky, kx, Cin)
    # -> (Cout, 9*Cin); row layout matches the stacked RHS (tap-major, Cin-minor).
    wg = jnp.transpose(conv_w, (0, 2, 3, 1)).reshape(Cout, 9 * Cin).astype(
        jnp.bfloat16)

    # Precomputed column-wraparound masks (grid-invariant 0/1 vectors).
    col = jnp.arange(HW, dtype=jnp.int32) % W
    masks = jnp.stack([col != 0, col != (W - 1)]).astype(jnp.float32)  # (2, HW)

    in_itemsize = x_flat.dtype.itemsize
    out_itemsize = jnp.dtype(out_dtype).itemsize
    B_blk = _pick_batch_block(N, Cin, Cout, HW, in_itemsize, out_itemsize)
    grid = (N // B_blk,)

    kernel = functools.partial(basic_block_kernel, H=H, W=W)

    # Explicit VMEM budget (double-buffered in/out blocks + invariants + scratch),
    # clipped to 48 MiB so it also fits v7x's 64 MiB physical VMEM.
    in_blk = B_blk * Cin * HW * in_itemsize
    out_blk = B_blk * (Cin + Cout) * HW * out_itemsize
    const_bytes = int(wg.size) * 2 + (int(scale2.size) + int(bias2.size)
                                      + int(masks.size)) * 4
    scratch_bytes = Cin * ((H + 2) * W + 2) * 4 + 9 * Cin * B_blk * HW * 2
    est = 2 * (in_blk + out_blk + const_bytes) + scratch_bytes + (2 << 20)
    vmem_limit = int(min(max(est, 16 << 20), 48 << 20))

    out_flat = pl.pallas_call(
        kernel,
        out_shape=jax.ShapeDtypeStruct((N, Cin + Cout, HW), out_dtype),
        grid_spec=pltpu.PrefetchScalarGridSpec(
            num_scalar_prefetch=0,
            grid=grid,
            in_specs=[
                pl.BlockSpec((B_blk, Cin, HW), lambda b: (b, 0, 0)),
                pl.BlockSpec((Cin, 1), lambda b: (0, 0)),
                pl.BlockSpec((Cin, 1), lambda b: (0, 0)),
                pl.BlockSpec((Cout, 9 * Cin), lambda b: (0, 0)),
                pl.BlockSpec((2, HW), lambda b: (0, 0)),
            ],
            out_specs=pl.BlockSpec((B_blk, Cin + Cout, HW),
                                   lambda b: (b, 0, 0)),
            scratch_shapes=[
                pltpu.VMEM((Cin, (H + 2) * W + 2), jnp.float32),
                pltpu.VMEM((9 * Cin, B_blk * HW), jnp.bfloat16),
            ],
        ),
        compiler_params=pltpu.CompilerParams(
            dimension_semantics=("parallel",),
            vmem_limit_bytes=vmem_limit),
    )(x_flat, scale2, bias2, wg, masks)

    return out_flat.reshape(N, Cin + Cout, H, W)    # free reshape


def basic_block_reference(x_nchw, gamma, beta, mean, var, w, eps=1e-5):
    """Pure-JAX reference matching PyTorch semantics (NCHW, eval-mode BN)."""
    xhat = (x_nchw - mean[None, :, None, None]) / jnp.sqrt(
        var[None, :, None, None] + eps)
    a = jnp.maximum(
        xhat * gamma[None, :, None, None] + beta[None, :, None, None], 0.0)
    out = lax.conv_general_dilated(
        a, w, window_strides=(1, 1), padding=((1, 1), (1, 1)),
        dimension_numbers=("NCHW", "OIHW", "NCHW"))
    return jnp.concatenate([x_nchw, out], axis=1)


if __name__ == "__main__":
    N, Cin, Cout, H, W = 2, 4, 8, 16, 16

    key = jax.random.PRNGKey(0)
    k_x, k_w, k_g, k_b, k_m, k_v = jax.random.split(key, 6)

    x = jax.random.normal(k_x, (N, Cin, H, W), dtype=jnp.float32)
    conv_w = 0.1 * jax.random.normal(k_w, (Cout, Cin, 3, 3), dtype=jnp.float32)
    gamma = 1.0 + 0.1 * jax.random.normal(k_g, (Cin,), dtype=jnp.float32)
    beta = 0.1 * jax.random.normal(k_b, (Cin,), dtype=jnp.float32)
    running_mean = 0.1 * jax.random.normal(k_m, (Cin,), dtype=jnp.float32)
    running_var = jax.random.uniform(k_v, (Cin,), dtype=jnp.float32,
                                     minval=0.5, maxval=1.5)

    out = basic_block(x, gamma, beta, running_mean, running_var, conv_w)
    out = jax.block_until_ready(out)

    ref = basic_block_reference(x, gamma, beta, running_mean, running_var,
                                conv_w)
    assert out.shape == (N, Cin + Cout, H, W), out.shape
    # bf16 MXU operands (f32 accumulate) -> loosened tolerance vs. f32 reference.
    assert jnp.allclose(out, ref, atol=5e-2, rtol=5e-2), float(
        jnp.max(jnp.abs(out - ref)))

    print("KERNEL_OK")
</pallas_src>

<mosaic_0001>
module attributes {stable_mosaic.version = 11 : i64} {
  func.func @basic_block_kernel(%arg0: i32, %arg1: memref<2x4x256xf32, #tpu.memory_space<vmem>>, %arg2: memref<4x1xf32, #tpu.memory_space<vmem>>, %arg3: memref<4x1xf32, #tpu.memory_space<vmem>>, %arg4: memref<8x36xbf16, #tpu.memory_space<vmem>>, %arg5: memref<2x256xf32, #tpu.memory_space<vmem>>, %arg6: memref<2x12x256xf32, #tpu.memory_space<vmem>>, %arg7: memref<4x290xf32, #tpu.memory_space<vmem>>, %arg8: memref<36x512xbf16, #tpu.memory_space<vmem>>) attributes {dimension_semantics = [#tpu.dimension_semantics<parallel>], iteration_bounds = array<i64: 1>, scalar_prefetch = 0 : i64, scratch_operands = 2 : i64, tpu.core_type = #tpu.core_type<tc>, window_params = [{transform_indices = @transform_0, window_bounds = array<i64: 2, 4, 256>}, {pipeline_mode = #tpu.pipeline_mode<synchronous>, transform_indices = @transform_1, window_bounds = array<i64: 4, 1>}, {pipeline_mode = #tpu.pipeline_mode<synchronous>, transform_indices = @transform_2, window_bounds = array<i64: 4, 1>}, {pipeline_mode = #tpu.pipeline_mode<synchronous>, transform_indices = @transform_3, window_bounds = array<i64: 8, 36>}, {pipeline_mode = #tpu.pipeline_mode<synchronous>, transform_indices = @transform_4, window_bounds = array<i64: 2, 256>}, {transform_indices = @transform_5, window_bounds = array<i64: 2, 12, 256>}]} {
    %cst = arith.constant 0.000000e+00 : f32
    %0 = vector.broadcast %cst : f32 to vector<4x17xf32>
    %c0 = arith.constant 0 : index
    %c0_0 = arith.constant 0 : index
    %1 = vector.load %arg7[%c0, %c0_0] : memref<4x290xf32, #tpu.memory_space<vmem>>, vector<4x17xf32>
    tpu.vector_store %arg7[%c0, %c0_0], %0 {strides = array<i32>} : memref<4x290xf32, #tpu.memory_space<vmem>>, vector<4x17xf32>,
    %cst_1 = arith.constant 0.000000e+00 : f32
    %2 = vector.broadcast %cst_1 : f32 to vector<4x17xf32>
    %c0_2 = arith.constant 0 : index
    %c273 = arith.constant 273 : index
    %3 = vector.load %arg7[%c0_2, %c273] : memref<4x290xf32, #tpu.memory_space<vmem>>, vector<4x17xf32>
    tpu.vector_store %arg7[%c0_2, %c273], %2 {strides = array<i32>} : memref<4x290xf32, #tpu.memory_space<vmem>>, vector<4x17xf32>,
    %c0_3 = arith.constant 0 : index
    %c0_4 = arith.constant 0 : index
    %4 = vector.load %arg5[%c0_3, %c0_4] : memref<2x256xf32, #tpu.memory_space<vmem>>, vector<1x256xf32>
    %c1 = arith.constant 1 : index
    %c0_5 = arith.constant 0 : index
    %5 = vector.load %arg5[%c1, %c0_5] : memref<2x256xf32, #tpu.memory_space<vmem>>, vector<1x256xf32>
    %c0_6 = arith.constant 0 : index
    %c0_7 = arith.constant 0 : index
    %c0_8 = arith.constant 0 : index
    %6 = vector.load %arg1[%c0_6, %c0_7, %c0_8] : memref<2x4x256xf32, #tpu.memory_space<vmem>>, vector<1x4x256xf32>
    %7 = vector.shape_cast %6 : vector<1x4x256xf32> to vector<4x256xf32>
    %c0_9 = arith.constant 0 : index
    %c0_10 = arith.constant 0 : index
    %c0_11 = arith.constant 0 : index
    %8 = vector.load %arg6[%c0_9, %c0_10, %c0_11] : memref<2x12x256xf32, #tpu.memory_space<vmem>>, vector<1x4x256xf32>
    %9 = vector.shape_cast %8 : vector<1x4x256xf32> to vector<4x256xf32>
    %10 = vector.shape_cast %7 : vector<4x256xf32> to vector<1x4x256xf32>
    tpu.vector_store %arg6[%c0_9, %c0_10, %c0_11], %10 {strides = array<i32>} : memref<2x12x256xf32, #tpu.memory_space<vmem>>, vector<1x4x256xf32>,
    %c0_12 = arith.constant 0 : index
    %c0_13 = arith.constant 0 : index
    %11 = vector.load %arg2[%c0_12, %c0_13] : memref<4x1xf32, #tpu.memory_space<vmem>>, vector<4x1xf32>
    %12 = vector.broadcast %11 : vector<4x1xf32> to vector<4x256xf32>
    %13 = arith.mulf %7, %12 : vector<4x256xf32>
    %c0_14 = arith.constant 0 : index
    %c0_15 = arith.constant 0 : index
    %14 = vector.load %arg3[%c0_14, %c0_15] : memref<4x1xf32, #tpu.memory_space<vmem>>, vector<4x1xf32>
    %15 = vector.broadcast %14 : vector<4x1xf32> to vector<4x256xf32>
    %16 = arith.addf %13, %15 : vector<4x256xf32>
    %cst_16 = arith.constant 0.000000e+00 : f32
    %17 = vector.broadcast %cst_16 : f32 to vector<4x256xf32>
    %18 = arith.maximumf %16, %17 : vector<4x256xf32>
    %c0_17 = arith.constant 0 : index
    %c17 = arith.constant 17 : index
    %19 = vector.load %arg7[%c0_17, %c17] : memref<4x290xf32, #tpu.memory_space<vmem>>, vector<4x256xf32>
    tpu.vector_store %arg7[%c0_17, %c17], %18 {strides = array<i32>} : memref<4x290xf32, #tpu.memory_space<vmem>>, vector<4x256xf32>,
    %c0_18 = arith.constant 0 : index
    %c0_19 = arith.constant 0 : index
    %20 = vector.load %arg7[%c0_18, %c0_19] : memref<4x290xf32, #tpu.memory_space<vmem>>, vector<4x256xf32>
    %21 = vector.broadcast %4 : vector<1x256xf32> to vector<4x256xf32>
    %22 = arith.mulf %20, %21 : vector<4x256xf32>
    %23 = arith.truncf %22 : vector<4x256xf32> to vector<4x256xbf16>
    %c0_20 = arith.constant 0 : index
    %c0_21 = arith.constant 0 : index
    %24 = vector.load %arg8[%c0_20, %c0_21] : memref<36x512xbf16, #tpu.memory_space<vmem>>, vector<4x256xbf16>
    tpu.vector_store %arg8[%c0_20, %c0_21], %23 {strides = array<i32>} : memref<36x512xbf16, #tpu.memory_space<vmem>>, vector<4x256xbf16>,
    %c0_22 = arith.constant 0 : index
    %c1_23 = arith.constant 1 : index
    %25 = vector.load %arg7[%c0_22, %c1_23] : memref<4x290xf32, #tpu.memory_space<vmem>>, vector<4x256xf32>
    %26 = arith.truncf %25 : vector<4x256xf32> to vector<4x256xbf16>
    %c4 = arith.constant 4 : index
    %c0_24 = arith.constant 0 : index
    %27 = vector.load %arg8[%c4, %c0_24] : memref<36x512xbf16, #tpu.memory_space<vmem>>, vector<4x256xbf16>
    tpu.vector_store %arg8[%c4, %c0_24], %26 {strides = array<i32>} : memref<36x512xbf16, #tpu.memory_space<vmem>>, vector<4x256xbf16>,
    %c0_25 = arith.constant 0 : index
    %c2 = arith.constant 2 : index
    %28 = vector.load %arg7[%c0_25, %c2] : memref<4x290xf32, #tpu.memory_space<vmem>>, vector<4x256xf32>
    %29 = vector.broadcast %5 : vector<1x256xf32> to vector<4x256xf32>
    %30 = arith.mulf %28, %29 : vector<4x256xf32>
    %31 = arith.truncf %30 : vector<4x256xf32> to vector<4x256xbf16>
    %c8 = arith.constant 8 : index
    %c0_26 = arith.constant 0 : index
    %32 = vector.load %arg8[%c8, %c0_26] : memref<36x512xbf16, #tpu.memory_space<vmem>>, vector<4x256xbf16>
    tpu.vector_store %arg8[%c8, %c0_26], %31 {strides = array<i32>} : memref<36x512xbf16, #tpu.memory_space<vmem>>, vector<4x256xbf16>,
    %c0_27 = arith.constant 0 : index
    %c16 = arith.constant 16 : index
    %33 = vector.load %arg7[%c0_27, %c16] : memref<4x290xf32, #tpu.memory_space<vmem>>, vector<4x256xf32>
    %34 = vector.broadcast %4 : vector<1x256xf32> to vector<4x256xf32>
    %35 = arith.mulf %33, %34 : vector<4x256xf32>
    %36 = arith.truncf %35 : vector<4x256xf32> to vector<4x256xbf16>
    %c12 = arith.constant 12 : index
    %c0_28 = arith.constant 0 : index
    %37 = vector.load %arg8[%c12, %c0_28] : memref<36x512xbf16, #tpu.memory_space<vmem>>, vector<4x256xbf16>
    tpu.vector_store %arg8[%c12, %c0_28], %36 {strides = array<i32>} : memref<36x512xbf16, #tpu.memory_space<vmem>>, vector<4x256xbf16>,
    %c0_29 = arith.constant 0 : index
    %c17_30 = arith.constant 17 : index
    %38 = vector.load %arg7[%c0_29, %c17_30] : memref<4x290xf32, #tpu.memory_space<vmem>>, vector<4x256xf32>
    %39 = arith.truncf %38 : vector<4x256xf32> to vector<4x256xbf16>
    %c16_31 = arith.constant 16 : index
    %c0_32 = arith.constant 0 : index
    %40 = vector.load %arg8[%c16_31, %c0_32] : memref<36x512xbf16, #tpu.memory_space<vmem>>, vector<4x256xbf16>
    tpu.vector_store %arg8[%c16_31, %c0_32], %39 {strides = array<i32>} : memref<36x512xbf16, #tpu.memory_space<vmem>>, vector<4x256xbf16>,
    %c0_33 = arith.constant 0 : index
    %c18 = arith.constant 18 : index
    %41 = vector.load %arg7[%c0_33, %c18] : memref<4x290xf32, #tpu.memory_space<vmem>>, vector<4x256xf32>
    %42 = vector.broadcast %5 : vector<1x256xf32> to vector<4x256xf32>
    %43 = arith.mulf %41, %42 : vector<4x256xf32>
    %44 = arith.truncf %43 : vector<4x256xf32> to vector<4x256xbf16>
    %c20 = arith.constant 20 : index
    %c0_34 = arith.constant 0 : index
    %45 = vector.load %arg8[%c20, %c0_34] : memref<36x512xbf16, #tpu.memory_space<vmem>>, vector<4x256xbf16>
    tpu.vector_store %arg8[%c20, %c0_34], %44 {strides = array<i32>} : memref<36x512xbf16, #tpu.memory_space<vmem>>, vector<4x256xbf16>,
    %c0_35 = arith.constant 0 : index
    %c32 = arith.constant 32 : index
    %46 = vector.load %arg7[%c0_35, %c32] : memref<4x290xf32, #tpu.memory_space<vmem>>, vector<4x256xf32>
    %47 = vector.broadcast %4 : vector<1x256xf32> to vector<4x256xf32>
    %48 = arith.mulf %46, %47 : vector<4x256xf32>
    %49 = arith.truncf %48 : vector<4x256xf32> to vector<4x256xbf16>
    %c24 = arith.constant 24 : index
    %c0_36 = arith.constant 0 : index
    %50 = vector.load %arg8[%c24, %c0_36] : memref<36x512xbf16, #tpu.memory_space<vmem>>, vector<4x256xbf16>
    tpu.vector_store %arg8[%c24, %c0_36], %49 {strides = array<i32>} : memref<36x512xbf16, #tpu.memory_space<vmem>>, vector<4x256xbf16>,
    %c0_37 = arith.constant 0 : index
    %c33 = arith.constant 33 : index
    %51 = vector.load %arg7[%c0_37, %c33] : memref<4x290xf32, #tpu.memory_space<vmem>>, vector<4x256xf32>
    %52 = arith.truncf %51 : vector<4x256xf32> to vector<4x256xbf16>
    %c28 = arith.constant 28 : index
    %c0_38 = arith.constant 0 : index
    %53 = vector.load %arg8[%c28, %c0_38] : memref<36x512xbf16, #tpu.memory_space<vmem>>, vector<4x256xbf16>
    tpu.vector_store %arg8[%c28, %c0_38], %52 {strides = array<i32>} : memref<36x512xbf16, #tpu.memory_space<vmem>>, vector<4x256xbf16>,
    %c0_39 = arith.constant 0 : index
    %c34 = arith.constant 34 : index
    %54 = vector.load %arg7[%c0_39, %c34] : memref<4x290xf32, #tpu.memory_space<vmem>>, vector<4x256xf32>
    %55 = vector.broadcast %5 : vector<1x256xf32> to vector<4x256xf32>
    %56 = arith.mulf %54, %55 : vector<4x256xf32>
    %57 = arith.truncf %56 : vector<4x256xf32> to vector<4x256xbf16>
    %c32_40 = arith.constant 32 : index
    %c0_41 = arith.constant 0 : index
    %58 = vector.load %arg8[%c32_40, %c0_41] : memref<36x512xbf16, #tpu.memory_space<vmem>>, vector<4x256xbf16>
    tpu.vector_store %arg8[%c32_40, %c0_41], %57 {strides = array<i32>} : memref<36x512xbf16, #tpu.memory_space<vmem>>, vector<4x256xbf16>,
    %c1_42 = arith.constant 1 : index
    %c0_43 = arith.constant 0 : index
    %c0_44 = arith.constant 0 : index
    %59 = vector.load %arg1[%c1_42, %c0_43, %c0_44] : memref<2x4x256xf32, #tpu.memory_space<vmem>>, vector<1x4x256xf32>
    %60 = vector.shape_cast %59 : vector<1x4x256xf32> to vector<4x256xf32>
    %c1_45 = arith.constant 1 : index
    %c0_46 = arith.constant 0 : index
    %c0_47 = arith.constant 0 : index
    %61 = vector.load %arg6[%c1_45, %c0_46, %c0_47] : memref<2x12x256xf32, #tpu.memory_space<vmem>>, vector<1x4x256xf32>
    %62 = vector.shape_cast %61 : vector<1x4x256xf32> to vector<4x256xf32>
    %63 = vector.shape_cast %60 : vector<4x256xf32> to vector<1x4x256xf32>
    tpu.vector_store %arg6[%c1_45, %c0_46, %c0_47], %63 {strides = array<i32>} : memref<2x12x256xf32, #tpu.memory_space<vmem>>, vector<1x4x256xf32>,
    %c0_48 = arith.constant 0 : index
    %c0_49 = arith.constant 0 : index
    %64 = vector.load %arg2[%c0_48, %c0_49] : memref<4x1xf32, #tpu.memory_space<vmem>>, vector<4x1xf32>
    %65 = vector.broadcast %64 : vector<4x1xf32> to vector<4x256xf32>
    %66 = arith.mulf %60, %65 : vector<4x256xf32>
    %c0_50 = arith.constant 0 : index
    %c0_51 = arith.constant 0 : index
    %67 = vector.load %arg3[%c0_50, %c0_51] : memref<4x1xf32, #tpu.memory_space<vmem>>, vector<4x1xf32>
    %68 = vector.broadcast %67 : vector<4x1xf32> to vector<4x256xf32>
    %69 = arith.addf %66, %68 : vector<4x256xf32>
    %cst_52 = arith.constant 0.000000e+00 : f32
    %70 = vector.broadcast %cst_52 : f32 to vector<4x256xf32>
    %71 = arith.maximumf %69, %70 : vector<4x256xf32>
    %c0_53 = arith.constant 0 : index
    %c17_54 = arith.constant 17 : index
    %72 = vector.load %arg7[%c0_53, %c17_54] : memref<4x290xf32, #tpu.memory_space<vmem>>, vector<4x256xf32>
    tpu.vector_store %arg7[%c0_53, %c17_54], %71 {strides = array<i32>} : memref<4x290xf32, #tpu.memory_space<vmem>>, vector<4x256xf32>,
    %c0_55 = arith.constant 0 : index
    %c0_56 = arith.constant 0 : index
    %73 = vector.load %arg7[%c0_55, %c0_56] : memref<4x290xf32, #tpu.memory_space<vmem>>, vector<4x256xf32>
    %74 = vector.broadcast %4 : vector<1x256xf32> to vector<4x256xf32>
    %75 = arith.mulf %73, %74 : vector<4x256xf32>
    %76 = arith.truncf %75 : vector<4x256xf32> to vector<4x256xbf16>
    %c0_57 = arith.constant 0 : index
    %c256 = arith.constant 256 : index
    %77 = vector.load %arg8[%c0_57, %c256] : memref<36x512xbf16, #tpu.memory_space<vmem>>, vector<4x256xbf16>
    tpu.vector_store %arg8[%c0_57, %c256], %76 {strides = array<i32>} : memref<36x512xbf16, #tpu.memory_space<vmem>>, vector<4x256xbf16>,
    %c0_58 = arith.constant 0 : index
    %c1_59 = arith.constant 1 : index
    %78 = vector.load %arg7[%c0_58, %c1_59] : memref<4x290xf32, #tpu.memory_space<vmem>>, vector<4x256xf32>
    %79 = arith.truncf %78 : vector<4x256xf32> to vector<4x256xbf16>
    %c4_60 = arith.constant 4 : index
    %c256_61 = arith.constant 256 : index
    %80 = vector.load %arg8[%c4_60, %c256_61] : memref<36x512xbf16, #tpu.memory_space<vmem>>, vector<4x256xbf16>
    tpu.vector_store %arg8[%c4_60, %c256_61], %79 {strides = array<i32>} : memref<36x512xbf16, #tpu.memory_space<vmem>>, vector<4x256xbf16>,
    %c0_62 = arith.constant 0 : index
    %c2_63 = arith.constant 2 : index
    %81 = vector.load %arg7[%c0_62, %c2_63] : memref<4x290xf32, #tpu.memory_space<vmem>>, vector<4x256xf32>
    %82 = vector.broadcast %5 : vector<1x256xf32> to vector<4x256xf32>
    %83 = arith.mulf %81, %82 : vector<4x256xf32>
    %84 = arith.truncf %83 : vector<4x256xf32> to vector<4x256xbf16>
    %c8_64 = arith.constant 8 : index
    %c256_65 = arith.constant 256 : index
    %85 = vector.load %arg8[%c8_64, %c256_65] : memref<36x512xbf16, #tpu.memory_space<vmem>>, vector<4x256xbf16>
    tpu.vector_store %arg8[%c8_64, %c256_65], %84 {strides = array<i32>} : memref<36x512xbf16, #tpu.memory_space<vmem>>, vector<4x256xbf16>,
    %c0_66 = arith.constant 0 : index
    %c16_67 = arith.constant 16 : index
    %86 = vector.load %arg7[%c0_66, %c16_67] : memref<4x290xf32, #tpu.memory_space<vmem>>, vector<4x256xf32>
    %87 = vector.broadcast %4 : vector<1x256xf32> to vector<4x256xf32>
    %88 = arith.mulf %86, %87 : vector<4x256xf32>
    %89 = arith.truncf %88 : vector<4x256xf32> to vector<4x256xbf16>
    %c12_68 = arith.constant 12 : index
    %c256_69 = arith.constant 256 : index
    %90 = vector.load %arg8[%c12_68, %c256_69] : memref<36x512xbf16, #tpu.memory_space<vmem>>, vector<4x256xbf16>
    tpu.vector_store %arg8[%c12_68, %c256_69], %89 {strides = array<i32>} : memref<36x512xbf16, #tpu.memory_space<vmem>>, vector<4x256xbf16>,
    %c0_70 = arith.constant 0 : index
    %c17_71 = arith.constant 17 : index
    %91 = vector.load %arg7[%c0_70, %c17_71] : memref<4x290xf32, #tpu.memory_space<vmem>>, vector<4x256xf32>
    %92 = arith.truncf %91 : vector<4x256xf32> to vector<4x256xbf16>
    %c16_72 = arith.constant 16 : index
    %c256_73 = arith.constant 256 : index
    %93 = vector.load %arg8[%c16_72, %c256_73] : memref<36x512xbf16, #tpu.memory_space<vmem>>, vector<4x256xbf16>
    tpu.vector_store %arg8[%c16_72, %c256_73], %92 {strides = array<i32>} : memref<36x512xbf16, #tpu.memory_space<vmem>>, vector<4x256xbf16>,
    %c0_74 = arith.constant 0 : index
    %c18_75 = arith.constant 18 : index
    %94 = vector.load %arg7[%c0_74, %c18_75] : memref<4x290xf32, #tpu.memory_space<vmem>>, vector<4x256xf32>
    %95 = vector.broadcast %5 : vector<1x256xf32> to vector<4x256xf32>
    %96 = arith.mulf %94, %95 : vector<4x256xf32>
    %97 = arith.truncf %96 : vector<4x256xf32> to vector<4x256xbf16>
    %c20_76 = arith.constant 20 : index
    %c256_77 = arith.constant 256 : index
    %98 = vector.load %arg8[%c20_76, %c256_77] : memref<36x512xbf16, #tpu.memory_space<vmem>>, vector<4x256xbf16>
    tpu.vector_store %arg8[%c20_76, %c256_77], %97 {strides = array<i32>} : memref<36x512xbf16, #tpu.memory_space<vmem>>, vector<4x256xbf16>,
    %c0_78 = arith.constant 0 : index
    %c32_79 = arith.constant 32 : index
    %99 = vector.load %arg7[%c0_78, %c32_79] : memref<4x290xf32, #tpu.memory_space<vmem>>, vector<4x256xf32>
    %100 = vector.broadcast %4 : vector<1x256xf32> to vector<4x256xf32>
    %101 = arith.mulf %99, %100 : vector<4x256xf32>
    %102 = arith.truncf %101 : vector<4x256xf32> to vector<4x256xbf16>
    %c24_80 = arith.constant 24 : index
    %c256_81 = arith.constant 256 : index
    %103 = vector.load %arg8[%c24_80, %c256_81] : memref<36x512xbf16, #tpu.memory_space<vmem>>, vector<4x256xbf16>
    tpu.vector_store %arg8[%c24_80, %c256_81], %102 {strides = array<i32>} : memref<36x512xbf16, #tpu.memory_space<vmem>>, vector<4x256xbf16>,
    %c0_82 = arith.constant 0 : index
    %c33_83 = arith.constant 33 : index
    %104 = vector.load %arg7[%c0_82, %c33_83] : memref<4x290xf32, #tpu.memory_space<vmem>>, vector<4x256xf32>
    %105 = arith.truncf %104 : vector<4x256xf32> to vector<4x256xbf16>
    %c28_84 = arith.constant 28 : index
    %c256_85 = arith.constant 256 : index
    %106 = vector.load %arg8[%c28_84, %c256_85] : memref<36x512xbf16, #tpu.memory_space<vmem>>, vector<4x256xbf16>
    tpu.vector_store %arg8[%c28_84, %c256_85], %105 {strides = array<i32>} : memref<36x512xbf16, #tpu.memory_space<vmem>>, vector<4x256xbf16>,
    %c0_86 = arith.constant 0 : index
    %c34_87 = arith.constant 34 : index
    %107 = vector.load %arg7[%c0_86, %c34_87] : memref<4x290xf32, #tpu.memory_space<vmem>>, vector<4x256xf32>
    %108 = vector.broadcast %5 : vector<1x256xf32> to vector<4x256xf32>
    %109 = arith.mulf %107, %108 : vector<4x256xf32>
    %110 = arith.truncf %109 : vector<4x256xf32> to vector<4x256xbf16>
    %c32_88 = arith.constant 32 : index
    %c256_89 = arith.constant 256 : index
    %111 = vector.load %arg8[%c32_88, %c256_89] : memref<36x512xbf16, #tpu.memory_space<vmem>>, vector<4x256xbf16>
    tpu.vector_store %arg8[%c32_88, %c256_89], %110 {strides = array<i32>} : memref<36x512xbf16, #tpu.memory_space<vmem>>, vector<4x256xbf16>,
    %c0_90 = arith.constant 0 : index
    %c0_91 = arith.constant 0 : index
    %112 = vector.load %arg4[%c0_90, %c0_91] : memref<8x36xbf16, #tpu.memory_space<vmem>>, vector<8x36xbf16>
    %c0_92 = arith.constant 0 : index
    %c0_93 = arith.constant 0 : index
    %113 = vector.load %arg8[%c0_92, %c0_93] : memref<36x512xbf16, #tpu.memory_space<vmem>>, vector<36x512xbf16>
    %cst_94 = arith.constant dense<0.000000e+00> : vector<8x512xf32>
    %114 = tpu.matmul %112, %113, %cst_94 {dimension_numbers = #tpu.dot_dimension_numbers<[1], [0], [0], [1], [0, 0, 1, 1], [], []>} : vector<8x36xbf16>, vector<36x512xbf16>, vector<8x512xf32> -> vector<8x512xf32>
    %115 = vector.extract_strided_slice %114 {offsets = [0, 0], sizes = [8, 256], strides = [1, 1]} : vector<8x512xf32> to vector<8x256xf32>
    %c0_95 = arith.constant 0 : index
    %c4_96 = arith.constant 4 : index
    %c0_97 = arith.constant 0 : index
    %116 = vector.load %arg6[%c0_95, %c4_96, %c0_97] : memref<2x12x256xf32, #tpu.memory_space<vmem>>, vector<1x8x256xf32>
    %117 = vector.shape_cast %116 : vector<1x8x256xf32> to vector<8x256xf32>
    %118 = vector.shape_cast %115 : vector<8x256xf32> to vector<1x8x256xf32>
    tpu.vector_store %arg6[%c0_95, %c4_96, %c0_97], %118 {strides = array<i32>} : memref<2x12x256xf32, #tpu.memory_space<vmem>>, vector<1x8x256xf32>,
    %119 = vector.extract_strided_slice %114 {offsets = [0, 256], sizes = [8, 256], strides = [1, 1]} : vector<8x512xf32> to vector<8x256xf32>
    %c1_98 = arith.constant 1 : index
    %c4_99 = arith.constant 4 : index
    %c0_100 = arith.constant 0 : index
    %120 = vector.load %arg6[%c1_98, %c4_99, %c0_100] : memref<2x12x256xf32, #tpu.memory_space<vmem>>, vector<1x8x256xf32>
    %121 = vector.shape_cast %120 : vector<1x8x256xf32> to vector<8x256xf32>
    %122 = vector.shape_cast %119 : vector<8x256xf32> to vector<1x8x256xf32>
    tpu.vector_store %arg6[%c1_98, %c4_99, %c0_100], %122 {strides = array<i32>} : memref<2x12x256xf32, #tpu.memory_space<vmem>>, vector<1x8x256xf32>,
    return
  }
  func.func @transform_0(%arg0: i32) -> (i32, i32, i32) {
    %c0_i32 = arith.constant 0 : i32
    %c0_i32_0 = arith.constant 0 : i32
    %c0_i32_1 = arith.constant 0 : i32
    return %arg0, %c0_i32, %c0_i32_0 : i32, i32, i32
  }
  func.func @transform_1(%arg0: i32) -> (i32, i32) {
    %c0_i32 = arith.constant 0 : i32
    %c0_i32_0 = arith.constant 0 : i32
    %c0_i32_1 = arith.constant 0 : i32
    return %c0_i32, %c0_i32_0 : i32, i32
  }
  func.func @transform_2(%arg0: i32) -> (i32, i32) {
    %c0_i32 = arith.constant 0 : i32
    %c0_i32_0 = arith.constant 0 : i32
    %c0_i32_1 = arith.constant 0 : i32
    return %c0_i32, %c0_i32_0 : i32, i32
  }
  func.func @transform_3(%arg0: i32) -> (i32, i32) {
    %c0_i32 = arith.constant 0 : i32
    %c0_i32_0 = arith.constant 0 : i32
    %c0_i32_1 = arith.constant 0 : i32
    return %c0_i32, %c0_i32_0 : i32, i32
  }
  func.func @transform_4(%arg0: i32) -> (i32, i32) {
    %c0_i32 = arith.constant 0 : i32
    %c0_i32_0 = arith.constant 0 : i32
    %c0_i32_1 = arith.constant 0 : i32
    return %c0_i32, %c0_i32_0 : i32, i32
  }
  func.func @transform_5(%arg0: i32) -> (i32, i32, i32) {
    %c0_i32 = arith.constant 0 : i32
    %c0_i32_0 = arith.constant 0 : i32
    %c0_i32_1 = arith.constant 0 : i32
    return %arg0, %c0_i32, %c0_i32_0 : i32, i32, i32
  }
}

</mosaic_0001>

<bundles_post_ra>
// kernel: tpu_custom_call.1
= control target key start
LH: loop header
LB: loop body
LE: loop exit
PB: predicated region body
PF: predicated region fallthrough
CT: control target
= control target key end

     0   :  { %10 = vsyncpa [#allocation5], 0  ;;  %s930_s21 = smov [#allocation4]   ;;  %s931_s23 = smov 128   ;;  %s1246_s0 = inlined_call_operand.hbm [shape: f32[2,4,256], index: 0, kind: input, shape index: {}]   ;;  %s1247_s1 = inlined_call_operand.vmem [shape: f32[4,1], index: 1, kind: input, shape index: {}]   ;;  %s1248_s2 = inlined_call_operand.vmem [shape: f32[4,1], index: 2, kind: input, shape index: {}]   ;;  %s1249_s3 = inlined_call_operand.vmem [shape: bf16[8,36], index: 3, kind: input, shape index: {}]   ;;  %s1250_s4 = inlined_call_operand.vmem [shape: f32[2,256], index: 4, kind: input, shape index: {}]   ;;  %s1251_s5 = inlined_call_operand.vmem [shape: f32[2,12,256], index: 5, kind: output, shape index: {}]  }
   0x1   :  { %s15_s20 = sshll.u32 %s1246_s0, 4  ;;  %s17_s22 = sshll.u32 %s930_s21, 4  ;;  %s16_s20 = int_to_ptr.hbm [resolvable:$true] %s15_s20  ;;  %s18_s22 = int_to_ptr.vmem [resolvable:$true] %s17_s22 }
   0x2   :  { %s932_s24 = smov 8  }
   0x3   :  { %23 = dma.hbm_to_vmem [thread:$0]  %s16_s20, 256, %s18_s22, [#allocation5], %s931_s23, %s931_s23, %s932_s24  }
   0x4   :  { %928 = dma.done.wait [#allocation5], 256  }
   0x5   :  { %929 = vsyncadd [#allocation5], 4294967040  ;;  %v933_v0 = vmov 0   ;;  %v53_v1 = vld [vmem:[%s1247_s1] sm:$0xf]  ;;  %vm94_vm0 = vcmask 1043456  }
   0x6   :  { %902 = vset.pattern.permute.xlu0 %v933_v0  ;;  %903 = vset.pattern.permute.xlu2 %v933_v0  ;;  %v41_v2 = vld [vmem:[%s1250_s4] ss:$2 sm:$0x3]  ;;  %s934_s30 = smov 16   ;;  %s935_s10 = smov 32   ;;  %v44_v10 = vld [vmem:[#allocation4] sm:$0xff] }
   0x7   :  { %56 = vperm.xlu0 %902, %v53_v1   ;;  %v91_v3 = vperm.slane %v41_v2, 0  ;;  %v92_v4 = vperm.slane %v41_v2, 1  ;;  %v64_v6 = vld [vmem:[%s1248_s2] sm:$0xf]  ;;  %46 = vst [vmem:[#allocation1] ss:$2 sm:$0xff] %v44_v10 }
   0x8   :  { %v400_v8 = vld [vmem:[%s1247_s1] sm:$0xf]  ;;  %v937_v18 = vmov 839922192   ;;  %vm37_vm1 = vcmask 134144   ;;  %vm39_vm2 = vcmask 273544  }
   0x9   :  { %v93_v5 = vrot.slane %v92_v4, 4  ;;  %v411_v9 = vld [vmem:[%s1248_s2] sm:$0xf]  ;;  %s936_s2 = smov 34   ;;  %v59_v19 = vunpack.c.l.s4 %v937_v18  ;;  %v938_v24 = vmov 0.0   ;;  %s940_s16 = smov 2  }
   0xa   :  { %v831_v13 = vld [vmem:[%s1250_s4 + $0x1] ss:$2 sm:$0x3]  ;;  %38 = vst.msk [vmem:[#allocation2] sm:$0xf] %vm37_vm1, %v938_v24  ;;  %s939_s4 = smov 17  }
   0xb   :  { %v993_v7 = vsel %vm94_vm0, %v91_v3, %v93_v5  ;;  %v141_v14 = vperm.slane %v831_v13, 1  ;;  %v140_v15 = vperm.slane %v831_v13, 0  ;;  %v60_v21 = vunpack.c.0.s8 %v59_v19  ;;  %40 = vst.msk [vmem:[#allocation2 + $0x8] sm:$0xf] %vm39_vm2, %v938_v24  ;;  %v1016_v32 = vld [vmem:[#allocation4 + $0x8] sm:$0xff]  ;;  %s941_s17 = smov 18  }
   0xc   :  { %181 = vrot.lane.b32.xlu2 %v993_v7, %s934_s30  ;;  %vm84_vm3 = vcmask 1043592   ;;  %vm85_vm4 = vcmask 1047556   ;;  %vm80_vm5 = vcmask 138240   ;;  %vm147_vm7 = vcmask 15360   ;;  %s942_s18 = smov 111   ;;  %s943_s19 = smov 110  }
   0xd   :  { %v142_v16 = vrot.slane %v141_v14, 4  ;;  %vm1019_vm6 = vmor %vm85_vm4, %vm84_vm3  ;;  %vm184_vm8 = vcmask 130048   ;;  %vm251_vm9 = vcmask 146432   ;;  %vm290_vm10 = vcmask 261120   ;;  %s944_s20 = smov 96   ;;  %s945_s21 = smov 94  }
   0xe   :  { %v47_v11 = vld.sshfl [vmem:[#allocation1] sm:$0xff pattern:$0x75316420]  ;;  %v48_v12 = vld.sshfl [vmem:[#allocation1 + $0x8] sm:$0xff pattern:$0x75316420] }
   0xf   :  { %67 = vperm.xlu0 %902, %v64_v6   ;;  %51 = vst [vmem:[%s1251_s5] sm:$0xf] %v47_v11  ;;  %v143_v17 = vsel %vm94_vm0, %v140_v15, %v142_v16  ;;  %vm357_vm11 = vcmask 277504   ;;  %s946_s22 = smov 127   ;;  %s947_s23 = smov 126   ;;  %vm242_vm12 = vcmask 908288   ;;  %vm281_vm13 = vcmask 900096  }
  0x10   :  { %52 = vst [vmem:[%s1251_s5 + $0x8] sm:$0xf] %v48_v12  ;;  %s948_s28 = smov 112   ;;  %s949_s0 = smov 95   ;;  %vm318_vm14 = vcmask 785408   ;;  %vm385_vm15 = vcmask 769024  }
  0x11   :  { %vm741_vm2 = vcmask 1041408   ;;  %vm175_vm3 = vcmask 1031168   ;;  %vm214_vm4 = vcmask 916480  }
  0x14   :  { %403 = vperm.xlu2 %903, %v400_v8  }
  0x17   :  { %414 = vperm.xlu0 %902, %v411_v9  }
  0x1c   :  { %287 = vrot.lane.b32.xlu2 %v993_v7, %s935_s10 }
  0x1f   :  { %354 = vrot.lane.b32.xlu0 %v143_v17, %s936_s2 }
  0x66   :  { %v1014_v28 = vpop.permute.xlu2 %181 }
  0x67   :  { %v1038_v55 = vrot.slane %v1014_v28, 4 }
  0x69   :  { %v1060_v8 = vsel %vm184_vm8, %v1038_v55, %v1014_v28 }
  0x6e   :  { %v404_v30 = vpop.permute.xlu2 %403 }
  0x6f   :  { %v408_v31 = vperm.slane %v404_v30, %v60_v21 }
  0x71   :  { %v410_v34 = vmul.f32 %v408_v31, %v1016_v32 }
  0x76   :  { %v288_v13 = vpop.permute.xlu2 %287 }
  0x79   :  { %v57_v20 = vpop.permute.xlu0 %56 }
  0x7a   :  { %v61_v22 = vperm.slane %v57_v20, %v60_v21 }
  0x7c   :  { %v63_v25 = vmul.f32 %v61_v22, %v44_v10 }
  0x81   :  { %v68_v23 = vpop.permute.xlu0 %67 }
  0x82   :  { %v72_v26 = vperm.slane %v68_v23, %v60_v21 }
  0x84   :  { %v74_v27 = vadd.f32 %v72_v26, %v63_v25 }
  0x86   :  { %v75_v29 = vmax.f32 %v74_v27, 0.0 }
  0x88   :  { %77 = vrot.lane.b32.xlu1 %v75_v29, %s939_s4 }
  0x89   :  { %v415_v33 = vpop.permute.xlu0 %414 }
  0x8a   :  { %v419_v35 = vperm.slane %v415_v33, %v60_v21 }
  0x8c   :  { %v421_v36 = vadd.f32 %v419_v35, %v410_v34 }
  0x8e   :  { %v422_v37 = vmax.f32 %v421_v36, 0.0 }
  0x90   :  { %144 = vrot.lane.b32.xlu1 %v143_v17, %s940_s16 }
  0x91   :  { %v355_v28 = vpop.permute.xlu0 %354 }
  0x92   :  { %v1089_v33 = vrot.slane %v355_v28, 4 }
  0x98   :  { %248 = vrot.lane.b32.xlu1 %v143_v17, %s941_s17  ;;  %v1071_v17 = vrot.slane %v288_v13, 4 }
  0x9a   :  { %v1087_v29 = vsel %vm290_vm10, %v1071_v17, %v288_v13 }
  0xa0   :  { %424 = vrot.lane.b32.xlu1 %v422_v37, %s939_s4 }
  0xfa   :  { %v78_v38 = vpop.permute.xlu1 %77 }
  0xfb   :  { %v79_v40 = vrot.slane %v78_v38, 4 }
  0xfd   :  { %v81_v41 = vsel %vm80_vm5, %v79_v40, %v78_v38  ;;  %88 = vst.msk [vmem:[#allocation2 + $0x8] sm:$0xf] %vm37_vm1, %v79_v40 }
  0xfe   :  { %87 = vst.msk [vmem:[#allocation2] sm:$0xff] %vm1019_vm6, %v81_v41 }
 0x102   :  { %v145_v42 = vpop.permute.xlu1 %144 }
 0x103   :  { %v1031_v46 = vrot.slane %v145_v42, 4 }
 0x104   :  { %v107_v43 = vld [vmem:[#allocation2 + $0x8] sm:$0xf] }
 0x105   :  { %v1027_v44 = vld [vmem:[#allocation2] sm:$0xff]  ;;  %112 = vst [vmem:[#allocation1 + $0x10] ss:$2 sm:$0xff] %v107_v43  ;;  %v138_v47 = vld [vmem:[#allocation2 + $0x8] sm:$0xf]  ;;  %v1041_v57 = vsel %vm147_vm7, %v1031_v46, %v145_v42 }
 0x106   :  { %v97_v45 = vmul.f32 %v993_v7, %v1027_v44  ;;  %v152_v49 = vmul.f32 %v1031_v46, %v138_v47  ;;  %v180_v53 = vld [vmem:[#allocation2 + $0x8] sm:$0xf]  ;;  %v151_v0 = vmul.f32 %v1041_v57, %v1027_v44  ;;  %v188_v9 = vmul.f32 %v1060_v8, %v1027_v44 }
 0x107   :  { %v189_v58 = vmul.f32 %v1038_v55, %v180_v53  ;;  %v323_v62 = vld [vmem:[#allocation2 + $0x8] sm:$0xf]  ;;  %v294_v34 = vmul.f32 %v1087_v29, %v1027_v44  ;;  %v1102_v47 = vsel %vm357_vm11, %v1089_v33, %v355_v28 }
 0x108   :  { %99 = vst [vmem:[#allocation1] ss:$2 sm:$0xff] %v97_v45  ;;  %v353_v63 = vld [vmem:[#allocation2 + $0x8] sm:$0xf] }
 0x109   :  { %v219_v1 = vld [vmem:[#allocation2 + $0x8] sm:$0xf]  ;;  %v362_v39 = vmul.f32 %v1089_v33, %v353_v63 }
 0x10a   :  { %v249_v48 = vpop.permute.xlu1 %248  ;;  %v286_v4 = vld [vmem:[#allocation2 + $0x8] sm:$0xf] }
 0x10b   :  { %v247_v5 = vld [vmem:[#allocation2 + $0x8] sm:$0xf]  ;;  %v1064_v10 = vrot.slane %v249_v48, 4  ;;  %v295_v20 = vmul.f32 %v1071_v17, %v286_v4 }
 0x10c   :  { %v1034_v50 = vld.sshfl [vmem:[#allocation1 + $0x10] sm:$0xff pattern:$0x75316420] }
 0x10d   :  { %157 = vst [vmem:[#allocation1 + $0x10] ss:$2 sm:$0xff] %v152_v49  ;;  %v256_v14 = vmul.f32 %v1064_v10, %v247_v5  ;;  %v1081_v21 = vsel %vm251_vm9, %v1064_v10, %v249_v48 }
 0x10e   :  { %v255_v24 = vmul.f32 %v1081_v21, %v1027_v44 }
 0x10f   :  { %v100_v51 = vld.sshfl [vmem:[#allocation1] sm:$0xff pattern:$0x75316420]  ;;  %v101_v52 = vld.sshfl [vmem:[#allocation1 + $0x8] sm:$0xff pattern:$0x75316420] }
 0x110   :  { %110 = vst [vmem:[#allocation1] ss:$2 sm:$0xff] %v1027_v44  ;;  %v104_v54 = vpack.c.bf16 %v101_v52, %v100_v51  ;;  %v361_v52 = vmul.f32 %v1102_v47, %v1027_v44 }
 0x112   :  { %v425_v56 = vpop.permute.xlu1 %424  ;;  %105 = vst [vmem:[#allocation3] sm:$0x33] %v104_v54 }
 0x113   :  { %v426_v59 = vrot.slane %v425_v56, 4 }
 0x114   :  { %v1044_v60 = vld.sshfl [vmem:[#allocation1 + $0x10] sm:$0xff pattern:$0x75316420] }
 0x115   :  { %194 = vst [vmem:[#allocation1 + $0x10] ss:$2 sm:$0xff] %v189_v58  ;;  %v427_v61 = vsel %vm80_vm5, %v426_v59, %v425_v56  ;;  %vm348_vm5 = vcmask 777216  }
 0x116   :  { %430 = vst.msk [vmem:[#allocation2] sm:$0xff] %vm1019_vm6, %v427_v61  ;;  %vm737_vm6 = vcmask 293888  }
 0x117   :  { %v1051_v2 = vld.sshfl [vmem:[#allocation1] sm:$0xff pattern:$0x75316420]  ;;  %v1053_v3 = vld.sshfl [vmem:[#allocation1 + $0x8] sm:$0xff pattern:$0x75316420] }
 0x118   :  { %155 = vst [vmem:[#allocation1] ss:$2 sm:$0xff] %v151_v0 }
 0x119   :  { %431 = vst.msk [vmem:[#allocation2 + $0x8] sm:$0xf] %vm37_vm1, %v426_v59  ;;  %vm133_vm1 = vcmask 1039360  }
 0x11c   :  { %v1056_v6 = vld.sshfl [vmem:[#allocation1 + $0x10] sm:$0xff pattern:$0x75316420] }
 0x11d   :  { %224 = vst [vmem:[#allocation1 + $0x10] ss:$2 sm:$0xff] %v219_v1 }
 0x11f   :  { %v1066_v11 = vld.sshfl [vmem:[#allocation1] sm:$0xff pattern:$0x75316420]  ;;  %v1068_v12 = vld.sshfl [vmem:[#allocation1 + $0x8] sm:$0xff pattern:$0x75316420] }
 0x120   :  { %192 = vst [vmem:[#allocation1] ss:$2 sm:$0xff] %v188_v9  ;;  %v443_v49 = vld [vmem:[#allocation2 + $0x8] sm:$0xf] }
 0x121   :  { %v472_v53 = vld [vmem:[#allocation2 + $0x8] sm:$0xf] }
 0x122   :  { %v474_v58 = vmul.f32 %v472_v53, %v1031_v46  ;;  %v1116_v46 = vld [vmem:[#allocation2] sm:$0xff]  ;;  %v590_v28 = vld [vmem:[#allocation2 + $0x8] sm:$0xf] }
 0x124   :  { %v227_v15 = vld.sshfl [vmem:[#allocation1 + $0x10] sm:$0xff pattern:$0x75316420] }
 0x125   :  { %261 = vst [vmem:[#allocation1 + $0x10] ss:$2 sm:$0xff] %v256_v14  ;;  %v232_v16 = vpack.c.bf16 %v227_v15, %v227_v15  ;;  %v433_v15 = vmul.f32 %v1116_v46, %v993_v7 }
 0x127   :  { %v1073_v18 = vld.sshfl [vmem:[#allocation1] sm:$0xff pattern:$0x75316420]  ;;  %v1075_v19 = vld.sshfl [vmem:[#allocation1 + $0x8] sm:$0xff pattern:$0x75316420]  ;;  %237 = vrot.lane.b32.xlu0 %v232_v16, %s942_s18 }
 0x128   :  { %222 = vst [vmem:[#allocation1] ss:$2 sm:$0xff] %v1027_v44 }
 0x12c   :  { %v264_v22 = vld.sshfl [vmem:[#allocation1 + $0x10] sm:$0xff pattern:$0x75316420] }
 0x12d   :  { %v269_v23 = vpack.c.bf16 %v264_v22, %v264_v22  ;;  %300 = vst [vmem:[#allocation1 + $0x10] ss:$2 sm:$0xff] %v295_v20  ;;  %v559_v22 = vld [vmem:[#allocation2 + $0x8] sm:$0xf] }
 0x12f   :  { %v273_v25 = vrot.slane %v269_v23, 6  ;;  %v225_v26 = vld.sshfl [vmem:[#allocation1] sm:$0xff pattern:$0x75316420] }
 0x130   :  { %v226_v27 = vld.sshfl [vmem:[#allocation1 + $0x8] sm:$0xff pattern:$0x75316420] }
 0x131   :  { %276 = vrot.lane.b32.xlu2 %v273_v25, %s943_s19  ;;  %259 = vst [vmem:[#allocation1] ss:$2 sm:$0xff] %v255_v24  ;;  %v231_v35 = vpack.c.bf16 %v226_v27, %v225_v26  ;;  %v561_v24 = vmul.f32 %v559_v22, %v1064_v10 }
 0x134   :  { %v303_v30 = vld.sshfl [vmem:[#allocation1 + $0x10] sm:$0xff pattern:$0x75316420] }
 0x135   :  { %v308_v31 = vpack.c.bf16 %v303_v30, %v303_v30  ;;  %328 = vst [vmem:[#allocation1 + $0x10] ss:$2 sm:$0xff] %v323_v62  ;;  %v501_v62 = vld [vmem:[#allocation2 + $0x8] sm:$0xf]  ;;  %v473_v30 = vmul.f32 %v1116_v46, %v1041_v57 }
 0x136   :  { %v503_v4 = vmul.f32 %v501_v62, %v1038_v55  ;;  %v532_v55 = vld [vmem:[#allocation2 + $0x8] sm:$0xf] }
 0x137   :  { %313 = vrot.lane.b32.xlu1 %v308_v31, %s944_s20 }
 0x138   :  { %v262_v36 = vld.sshfl [vmem:[#allocation1] sm:$0xff pattern:$0x75316420]  ;;  %v263_v37 = vld.sshfl [vmem:[#allocation1 + $0x8] sm:$0xff pattern:$0x75316420] }
 0x139   :  { %235 = vrot.lane.b32.xlu2 %v231_v35, %s942_s18  ;;  %v268_v38 = vpack.c.bf16 %v263_v37, %v262_v36  ;;  %298 = vst [vmem:[#allocation1] ss:$2 sm:$0xff] %v294_v34  ;;  %v592_v35 = vmul.f32 %v590_v28, %v1071_v17 }
 0x13b   :  { %v272_v41 = vrot.slane %v268_v38, 6 }
 0x13c   :  { %v1096_v40 = vld.sshfl [vmem:[#allocation1 + $0x10] sm:$0xff pattern:$0x75316420] }
 0x13d   :  { %367 = vst [vmem:[#allocation1 + $0x10] ss:$2 sm:$0xff] %v362_v39 }
 0x13f   :  { %274 = vrot.lane.b32.xlu1 %v272_v41, %s943_s19  ;;  %v502_v41 = vmul.f32 %v1116_v46, %v1060_v8 }
 0x140   :  { %v301_v42 = vld.sshfl [vmem:[#allocation1] sm:$0xff pattern:$0x75316420]  ;;  %v302_v43 = vld.sshfl [vmem:[#allocation1 + $0x8] sm:$0xff pattern:$0x75316420] }
 0x141   :  { %v307_v45 = vpack.c.bf16 %v302_v43, %v301_v42  ;;  %326 = vst [vmem:[#allocation1] ss:$2 sm:$0xff] %v1027_v44 }
 0x143   :  { %311 = vrot.lane.b32.xlu0 %v307_v45, %s944_s20  ;;  %v619_v45 = vld [vmem:[#allocation2 + $0x8] sm:$0xf] }
 0x144   :  { %v370_v48 = vld.sshfl [vmem:[#allocation1 + $0x10] sm:$0xff pattern:$0x75316420] }
 0x145   :  { %v375_v51 = vpack.c.bf16 %v370_v48, %v370_v48  ;;  %448 = vst [vmem:[#allocation1 + $0x10] ss:$2 sm:$0xff] %v443_v49  ;;  %v648_v49 = vld [vmem:[#allocation2 + $0x8] sm:$0xf] }
 0x146   :  { %v650_v53 = vmul.f32 %v648_v49, %v1089_v33 }
 0x147   :  { %380 = vrot.lane.b32.xlu2 %v375_v51, %s945_s21 }
 0x148   :  { %v1107_v54 = vld.sshfl [vmem:[#allocation1] sm:$0xff pattern:$0x75316420]  ;;  %v1109_v56 = vld.sshfl [vmem:[#allocation1 + $0x8] sm:$0xff pattern:$0x75316420] }
 0x149   :  { %365 = vst [vmem:[#allocation1] ss:$2 sm:$0xff] %v361_v52 }
 0x14c   :  { %v451_v59 = vld.sshfl [vmem:[#allocation1 + $0x10] sm:$0xff pattern:$0x75316420] }
 0x14d   :  { %v456_v61 = vpack.c.bf16 %v451_v59, %v451_v59  ;;  %479 = vst [vmem:[#allocation1 + $0x10] ss:$2 sm:$0xff] %v474_v58 }
 0x14f   :  { %v460_v63 = vrot.slane %v456_v61, 6 }
 0x150   :  { %v368_v0 = vld.sshfl [vmem:[#allocation1] sm:$0xff pattern:$0x75316420]  ;;  %v369_v1 = vld.sshfl [vmem:[#allocation1 + $0x8] sm:$0xff pattern:$0x75316420] }
 0x151   :  { %463 = vrot.lane.b32.xlu0 %v460_v63, %s946_s22  ;;  %v374_v44 = vpack.c.bf16 %v369_v1, %v368_v0  ;;  %392 = vst [vmem:[#allocation1] ss:$2 sm:$0xff] %v1016_v32  ;;  %v560_v63 = vmul.f32 %v1116_v46, %v1081_v21 }
 0x153   :  { %378 = vrot.lane.b32.xlu1 %v374_v44, %s945_s21  ;;  %v591_v44 = vmul.f32 %v1116_v46, %v1087_v29 }
 0x154   :  { %v482_v5 = vld.sshfl [vmem:[#allocation1 + $0x10] sm:$0xff pattern:$0x75316420] }
 0x155   :  { %v487_v9 = vpack.c.bf16 %v482_v5, %v482_v5  ;;  %508 = vst [vmem:[#allocation1 + $0x10] ss:$2 sm:$0xff] %v503_v4 }
 0x157   :  { %492 = vrot.lane.b32.xlu2 %v487_v9, %s947_s23 }
 0x158   :  { %v393_v13 = vld.sshfl [vmem:[#allocation1] sm:$0xff pattern:$0x75316420]  ;;  %v394_v14 = vld.sshfl [vmem:[#allocation1 + $0x8] sm:$0xff pattern:$0x75316420] }
 0x159   :  { %832 = vst [vmem:[%s1251_s5 + $0x20] sm:$0xf] %v393_v13 }
 0x15a   :  { %833 = vst [vmem:[%s1251_s5 + $0x28] sm:$0xf] %v394_v14 }
 0x15b   :  { %435 = vst [vmem:[#allocation1] ss:$2 sm:$0xff] %v433_v15 }
 0x15c   :  { %v511_v32 = vld.sshfl [vmem:[#allocation1 + $0x10] sm:$0xff pattern:$0x75316420] }
 0x15d   :  { %v516_v16 = vpack.c.bf16 %v511_v32, %v511_v32  ;;  %537 = vst [vmem:[#allocation1 + $0x10] ss:$2 sm:$0xff] %v532_v55 }
 0x15f   :  { %v520_v20 = vrot.slane %v516_v16, 6 }
 0x161   :  { %523 = vrot.lane.b32.xlu1 %v520_v20, %s948_s28  ;;  %v119_v20 = vpack.c.bf16 %v1053_v3, %v1051_v2  ;;  %v336_v2 = vpack.c.bf16 %v1096_v40, %v1096_v40  ;;  %v164_v40 = vpack.c.bf16 %v1068_v12, %v1066_v11 }
 0x162   :  { %v436_v23 = vld.sshfl [vmem:[#allocation1] sm:$0xff pattern:$0x75316420]  ;;  %v437_v7 = vld.sshfl [vmem:[#allocation1 + $0x8] sm:$0xff pattern:$0x75316420] }
 0x163   :  { %446 = vst [vmem:[#allocation1] ss:$2 sm:$0xff] %v1116_v46  ;;  %v440_v25 = vpack.c.bf16 %v437_v7, %v436_v23  ;;  %v649_v23 = vmul.f32 %v1116_v46, %v1102_v47 }
 0x164   :  { %v540_v26 = vld.sshfl [vmem:[#allocation1 + $0x10] sm:$0xff pattern:$0x75316420] }
 0x165   :  { %566 = vst [vmem:[#allocation1 + $0x10] ss:$2 sm:$0xff] %v561_v24  ;;  %v545_v27 = vpack.c.bf16 %v540_v26, %v540_v26  ;;  %v123_v26 = vrot.slane %v119_v20, 6 }
 0x166   :  { %441 = vst [vmem:[#allocation3 + $0x8] sm:$0x33] %v440_v25 }
 0x169   :  { %550 = vrot.lane.b32.xlu1 %v545_v27, %s942_s18 }
 0x16a   :  { %v449_v31 = vld.sshfl [vmem:[#allocation1] sm:$0xff pattern:$0x75316420]  ;;  %v450_v34 = vld.sshfl [vmem:[#allocation1 + $0x8] sm:$0xff pattern:$0x75316420] }
 0x16b   :  { %v455_v36 = vpack.c.bf16 %v450_v34, %v449_v31  ;;  %477 = vst [vmem:[#allocation1] ss:$2 sm:$0xff] %v473_v30 }
 0x16c   :  { %v569_v10 = vld.sshfl [vmem:[#allocation1 + $0x10] sm:$0xff pattern:$0x75316420] }
 0x16d   :  { %v459_v37 = vrot.slane %v455_v36, 6  ;;  %v574_v38 = vpack.c.bf16 %v569_v10, %v569_v10  ;;  %597 = vst [vmem:[#allocation1 + $0x10] ss:$2 sm:$0xff] %v592_v35  ;;  %v340_v36 = vrot.slane %v336_v2, 6  ;;  %v335_v10 = vpack.c.bf16 %v1109_v56, %v1107_v54 }
 0x16f   :  { %461 = vrot.lane.b32.xlu2 %v459_v37, %s946_s22  ;;  %v578_v39 = vrot.slane %v574_v38, 6  ;;  %v339_v38 = vrot.slane %v335_v10, 6 }
 0x171   :  { %581 = vrot.lane.b32.xlu0 %v578_v39, %s943_s19 }
 0x172   :  { %v480_v57 = vld.sshfl [vmem:[#allocation1] sm:$0xff pattern:$0x75316420]  ;;  %v481_v42 = vld.sshfl [vmem:[#allocation1 + $0x8] sm:$0xff pattern:$0x75316420] }
 0x173   :  { %v486_v43 = vpack.c.bf16 %v481_v42, %v480_v57  ;;  %506 = vst [vmem:[#allocation1] ss:$2 sm:$0xff] %v502_v41  ;;  %v202_v42 = vpack.c.bf16 %v1056_v6, %v1056_v6  ;;  %v201_v6 = vpack.c.bf16 %v1075_v19, %v1073_v18 }
 0x174   :  { %v600_v17 = vld.sshfl [vmem:[#allocation1 + $0x10] sm:$0xff pattern:$0x75316420] }
 0x175   :  { %490 = vrot.lane.b32.xlu1 %v486_v43, %s947_s23  ;;  %v605_v48 = vpack.c.bf16 %v600_v17, %v600_v17  ;;  %624 = vst [vmem:[#allocation1 + $0x10] ss:$2 sm:$0xff] %v619_v45 }
 0x177   :  { %610 = vrot.lane.b32.xlu2 %v605_v48, %s944_s20 }
 0x17a   :  { %v509_v51 = vld.sshfl [vmem:[#allocation1] sm:$0xff pattern:$0x75316420]  ;;  %v510_v52 = vld.sshfl [vmem:[#allocation1 + $0x8] sm:$0xff pattern:$0x75316420] }
 0x17b   :  { %v515_v8 = vpack.c.bf16 %v510_v52, %v509_v51  ;;  %535 = vst [vmem:[#allocation1] ss:$2 sm:$0xff] %v1116_v46  ;;  %v205_v51 = vrot.slane %v201_v6, 6 }
 0x17c   :  { %v627_v58 = vld.sshfl [vmem:[#allocation1 + $0x10] sm:$0xff pattern:$0x75316420] }
 0x17d   :  { %v519_v59 = vrot.slane %v515_v8, 6  ;;  %v632_v61 = vpack.c.bf16 %v627_v58, %v627_v58  ;;  %655 = vst [vmem:[#allocation1 + $0x10] ss:$2 sm:$0xff] %v650_v53 }
 0x17f   :  { %521 = vrot.lane.b32.xlu0 %v519_v59, %s948_s28  ;;  %v636_v62 = vrot.slane %v632_v61, 6 }
 0x181   :  { %639 = vrot.lane.b32.xlu1 %v636_v62, %s949_s0 }
 0x182   :  { %v538_v0 = vld.sshfl [vmem:[#allocation1] sm:$0xff pattern:$0x75316420]  ;;  %v539_v1 = vld.sshfl [vmem:[#allocation1 + $0x8] sm:$0xff pattern:$0x75316420] }
 0x183   :  { %564 = vst [vmem:[#allocation1] ss:$2 sm:$0xff] %v560_v63  ;;  %v544_v33 = vpack.c.bf16 %v539_v1, %v538_v0 }
 0x184   :  { %v658_v4 = vld.sshfl [vmem:[#allocation1 + $0x10] sm:$0xff pattern:$0x75316420] }
 0x185   :  { %v663_v15 = vpack.c.bf16 %v658_v4, %v658_v4 }
 0x187   :  { %548 = vrot.lane.b32.xlu0 %v544_v33, %s942_s18 }
 0x18a   :  { %v567_v5 = vld.sshfl [vmem:[#allocation1] sm:$0xff pattern:$0x75316420]  ;;  %v568_v9 = vld.sshfl [vmem:[#allocation1 + $0x8] sm:$0xff pattern:$0x75316420] }
 0x18b   :  { %v573_v13 = vpack.c.bf16 %v568_v9, %v567_v5  ;;  %595 = vst [vmem:[#allocation1] ss:$2 sm:$0xff] %v591_v44  ;;  %v277_v14 = vpop.permute.xlu2 %276 }
 0x18c   :  { %v279_v41 = vrot.slane %v277_v14, 4 }
 0x18d   :  { %v577_v21 = vrot.slane %v573_v13, 6 }
 0x18f   :  { %668 = vrot.lane.b32.xlu0 %v663_v15, %s945_s21  ;;  %579 = vrot.lane.b32.xlu2 %v577_v21, %s943_s19 }
 0x192   :  { %v598_v32 = vld.sshfl [vmem:[#allocation1] sm:$0xff pattern:$0x75316420]  ;;  %v599_v55 = vld.sshfl [vmem:[#allocation1 + $0x8] sm:$0xff pattern:$0x75316420] }
 0x193   :  { %v604_v16 = vpack.c.bf16 %v599_v55, %v598_v32  ;;  %622 = vst [vmem:[#allocation1] ss:$2 sm:$0xff] %v1116_v46  ;;  %v236_v29 = vpop.permute.xlu2 %235  ;;  %v165_v46 = vpack.c.bf16 %v1044_v60, %v1044_v60  ;;  %v120_v60 = vpack.c.bf16 %v1034_v50, %v1034_v50  ;;  %v206_v50 = vrot.slane %v202_v42, 6 }
 0x194   :  { %v239_v7 = vrot.slane %v236_v29, 4 }
 0x195   :  { %608 = vrot.lane.b32.xlu1 %v604_v16, %s944_s20  ;;  %v124_v56 = vrot.slane %v120_v60, 6 }
 0x199   :  { %v238_v22 = vpop.permute.xlu0 %237 }
 0x19a   :  { %v240_v24 = vrot.slane %v238_v22, 4  ;;  %v625_v25 = vld.sshfl [vmem:[#allocation1] sm:$0xff pattern:$0x75316420] }
 0x19b   :  { %v626_v27 = vld.sshfl [vmem:[#allocation1 + $0x8] sm:$0xff pattern:$0x75316420] }
 0x19c   :  { %v241_v28 = vsel %vm94_vm0, %v239_v7, %v240_v24  ;;  %v631_v30 = vpack.c.bf16 %v626_v27, %v625_v25  ;;  %653 = vst [vmem:[#allocation1] ss:$2 sm:$0xff] %v649_v23 }
 0x19d   :  { %125 = vrot.lane.b32.xlu1 %v123_v26, %s946_s22  ;;  %v243_v31 = vsel %vm242_vm12, %v236_v29, %v241_v28 }
 0x19e   :  { %v635_v34 = vrot.slane %v631_v30, 6  ;;  %245 = vst [vmem:[#allocation3 + $0x20] sm:$0x33] %v243_v31 }
 0x1a0   :  { %637 = vrot.lane.b32.xlu0 %v635_v34, %s949_s0 }
 0x1a1   :  { %v381_v48 = vpop.permute.xlu2 %380 }
 0x1a2   :  { %v383_v8 = vrot.slane %v381_v48, 4 }
 0x1a3   :  { %v656_v3 = vld.sshfl [vmem:[#allocation1] sm:$0xff pattern:$0x75316420]  ;;  %v657_v47 = vld.sshfl [vmem:[#allocation1 + $0x8] sm:$0xff pattern:$0x75316420] }
 0x1a4   :  { %v662_v35 = vpack.c.bf16 %v657_v47, %v656_v3 }
 0x1a5   :  { %170 = vrot.lane.b32.xlu1 %v165_v46, %s947_s23 }
 0x1a6   :  { %666 = vrot.lane.b32.xlu2 %v662_v35, %s945_s21 }
 0x1a8   :  { %343 = vrot.lane.b32.xlu0 %v340_v36, %s949_s0 }
 0x1a9   :  { %v314_v37 = vpop.permute.xlu1 %313 }
 0x1aa   :  { %v316_v17 = vrot.slane %v314_v37, 4 }
 0x1ae   :  { %341 = vrot.lane.b32.xlu2 %v339_v38, %s949_s0 }
 0x1b0   :  { %168 = vrot.lane.b32.xlu0 %v164_v40, %s947_s23 }
 0x1b1   :  { %v275_v39 = vpop.permute.xlu1 %274  ;;  %v493_v52 = vpop.permute.xlu2 %492 }
 0x1b2   :  { %v278_v57 = vrot.slane %v275_v39, 4  ;;  %v495_v29 = vrot.slane %v493_v52, 4 }
 0x1b4   :  { %v280_v54 = vsel %vm94_vm0, %v278_v57, %v279_v41 }
 0x1b5   :  { %v282_v43 = vsel %vm281_vm13, %v275_v39, %v280_v54  ;;  %v312_v45 = vpop.permute.xlu0 %311 }
 0x1b6   :  { %284 = vst [vmem:[#allocation3 + $0x20] sm:$0xcc] %v282_v43  ;;  %127 = vrot.lane.b32.xlu2 %v124_v56, %s946_s22  ;;  %v315_v11 = vrot.slane %v312_v45, 4 }
 0x1b8   :  { %v317_v12 = vsel %vm94_vm0, %v315_v11, %v316_v17  ;;  %209 = vrot.lane.b32.xlu0 %v206_v50, %s948_s28 }
 0x1b9   :  { %v319_v49 = vsel %vm318_vm14, %v312_v45, %v317_v12 }
 0x1ba   :  { %321 = vst [vmem:[#allocation3 + $0x30] sm:$0x33] %v319_v49 }
 0x1be   :  { %207 = vrot.lane.b32.xlu2 %v205_v51, %s948_s28 }
 0x1c3   :  { %v464_v59 = vpop.permute.xlu0 %463 }
 0x1c4   :  { %v466_v0 = vrot.slane %v464_v59, 4 }
 0x1c5   :  { %v379_v53 = vpop.permute.xlu1 %378 }
 0x1c6   :  { %v382_v58 = vrot.slane %v379_v53, 4 }
 0x1c8   :  { %v384_v61 = vsel %vm94_vm0, %v382_v58, %v383_v8 }
 0x1c9   :  { %v386_v62 = vsel %vm385_vm15, %v379_v53, %v384_v61  ;;  %v462_v63 = vpop.permute.xlu2 %461 }
 0x1ca   :  { %388 = vst [vmem:[#allocation3 + $0x40] sm:$0x33] %v386_v62  ;;  %v465_v18 = vrot.slane %v462_v63, 4 }
 0x1cc   :  { %v467_v19 = vsel %vm94_vm0, %v465_v18, %v466_v0 }
 0x1cd   :  { %v468_v1 = vsel %vm133_vm1, %v462_v63, %v467_v19 }
 0x1ce   :  { %470 = vst [vmem:[#allocation3 + $0x8] sm:$0xcc] %v468_v1 }
 0x1d1   :  { %v685_v33 = vld [vmem:[#allocation3 + $0x40] sm:$0x33]  ;;  %v611_v32 = vpop.permute.xlu2 %610 }
 0x1d2   :  { %v713_v44 = vunpack.c.l.b16 %v685_v33  ;;  %v714_v4 = vunpack.c.h.b16 %v685_v33  ;;  %v613_v42 = vrot.slane %v611_v32, 4 }
 0x1d3   :  { %v524_v5 = vpop.permute.xlu1 %523 }
 0x1d4   :  { %v725_v9 = vpack.c.b16 %v713_v44, %v713_v44  ;;  %v726_v13 = vpack.c.b16 %v714_v4, %v714_v4  ;;  %v526_v30 = vrot.slane %v524_v5, 4 }
 0x1d6   :  { %v743_v14 = vsel %vm741_vm2, %v725_v9, 0  ;;  %v746_v15 = vsel %vm741_vm2, %v726_v13, 0 }
 0x1d7   :  { %759 = vmatpush.bf16.msra.mxu0 %v743_v14  ;;  %772 = vmatpush.bf16.msra.mxu1 %v746_v15 }
 0x1db   :  { %v551_v21 = vpop.permute.xlu1 %550 }
 0x1dc   :  { %v553_v47 = vrot.slane %v551_v21, 4 }
 0x1e3   :  { %v582_v55 = vpop.permute.xlu0 %581 }
 0x1e4   :  { %v584_v23 = vrot.slane %v582_v55, 4 }
 0x1e7   :  { %v491_v16 = vpop.permute.xlu1 %490 }
 0x1e8   :  { %v494_v20 = vrot.slane %v491_v16, 4 }
 0x1e9   :  { %v580_v22 = vpop.permute.xlu2 %579 }
 0x1ea   :  { %v496_v7 = vsel %vm94_vm0, %v494_v20, %v495_v29  ;;  %v583_v24 = vrot.slane %v580_v22, 4  ;;  %v844_v20 = vld [vmem:[#allocation3 + $0x8] sm:$0xf] }
 0x1eb   :  { %v497_v25 = vsel %vm175_vm3, %v491_v16, %v496_v7 }
 0x1ec   :  { %499 = vst [vmem:[#allocation3 + $0x18] sm:$0x33] %v497_v25  ;;  %v585_v26 = vsel %vm94_vm0, %v583_v24, %v584_v23 }
 0x1ed   :  { %v586_v27 = vsel %vm281_vm13, %v580_v22, %v585_v26  ;;  %v875_v22 = vld [vmem:[#allocation3 + $0xc] sm:$0xf] }
 0x1ee   :  { %588 = vst [vmem:[#allocation3 + $0x28] sm:$0xcc] %v586_v27  ;;  %v852_v27 = vld [vmem:[#allocation3 + $0x20] sm:$0xf] }
 0x1f1   :  { %v522_v28 = vpop.permute.xlu0 %521 }
 0x1f2   :  { %v525_v31 = vrot.slane %v522_v28, 4 }
 0x1f3   :  { %v640_v10 = vpop.permute.xlu1 %639 }
 0x1f4   :  { %v527_v34 = vsel %vm94_vm0, %v525_v31, %v526_v30  ;;  %v642_v59 = vrot.slane %v640_v10, 4 }
 0x1f5   :  { %v528_v2 = vsel %vm214_vm4, %v522_v28, %v527_v34  ;;  %v676_v28 = vld [vmem:[%s1249_s3] sm:$0xf]  ;;  %v878_v34 = vld [vmem:[#allocation3 + $0x24] sm:$0xf] }
 0x1f6   :  { %530 = vst [vmem:[#allocation3 + $0x18] sm:$0xcc] %v528_v2 }
 0x1f9   :  { %v549_v3 = vpop.permute.xlu0 %548 }
 0x1fa   :  { %v552_v46 = vrot.slane %v549_v3, 4 }
 0x1fc   :  { %v554_v35 = vsel %vm94_vm0, %v552_v46, %v553_v47 }
 0x1fd   :  { %v555_v36 = vsel %vm242_vm12, %v549_v3, %v554_v35  ;;  %v877_v55 = vld [vmem:[#allocation3 + $0x14] sm:$0xf0]  ;;  %v846_v16 = vld [vmem:[#allocation3 + $0x18] sm:$0xf0] }
 0x1fe   :  { %557 = vst [vmem:[#allocation3 + $0x28] sm:$0x33] %v555_v36  ;;  %v845_v24 = vor.u32 %v877_v55, %v844_v20  ;;  %v849_v25 = vor.u32 %v875_v22, %v846_v16 }
 0x200   :  { %v667_v37 = vpop.permute.xlu2 %666 }
 0x201   :  { %v669_v38 = vpop.permute.xlu0 %668  ;;  %v670_v40 = vrot.slane %v667_v37, 4 }
 0x202   :  { %v671_v60 = vrot.slane %v669_v38, 4 }
 0x204   :  { %v672_v39 = vsel %vm94_vm0, %v670_v40, %v671_v60 }
 0x205   :  { %v673_v41 = vsel %vm385_vm15, %v667_v37, %v672_v39  ;;  %v860_v4 = vld [vmem:[#allocation3 + $0x28] sm:$0xf]  ;;  %v879_v13 = vld [vmem:[#allocation3 + $0x2c] sm:$0xf] }
 0x206   :  { %675 = vst [vmem:[#allocation3 + $0x48] sm:$0x33] %v673_v41 }
 0x207   :  { %v609_v57 = vpop.permute.xlu1 %608 }
 0x208   :  { %v612_v54 = vrot.slane %v609_v57, 4  ;;  %v342_v56 = vpop.permute.xlu2 %341 }
 0x209   :  { %v345_v1 = vrot.slane %v342_v56, 4 }
 0x20a   :  { %v614_v43 = vsel %vm94_vm0, %v612_v54, %v613_v42 }
 0x20b   :  { %v615_v45 = vsel %vm318_vm14, %v609_v57, %v614_v43 }
 0x20c   :  { %617 = vst [vmem:[#allocation3 + $0x38] sm:$0x33] %v615_v45 }
 0x20d   :  { %v686_v17 = vld [vmem:[#allocation3 + $0x48] sm:$0x33] }
 0x20e   :  { %v715_v11 = vunpack.c.l.b16 %v686_v17  ;;  %v716_v50 = vunpack.c.h.b16 %v686_v17 }
 0x20f   :  { %v126_v12 = vpop.permute.xlu1 %125 }
 0x210   :  { %v128_v6 = vpop.permute.xlu2 %127  ;;  %v129_v48 = vrot.slane %v126_v12, 4  ;;  %v727_v49 = vpack.c.b16 %v715_v11, %v715_v11  ;;  %v728_v51 = vpack.c.b16 %v716_v50, %v716_v50 }
 0x211   :  { %v130_v52 = vrot.slane %v128_v6, 4 }
 0x212   :  { %v638_v53 = vpop.permute.xlu0 %637  ;;  %v749_v8 = vsel %vm741_vm2, %v727_v49, 0  ;;  %v752_v58 = vsel %vm741_vm2, %v728_v51, 0 }
 0x213   :  { %v132_v61 = vsel %vm94_vm0, %v129_v48, %v130_v52  ;;  %v641_v62 = vrot.slane %v638_v53, 4  ;;  %785 = vmatpush.bf16.msra.mxu2 %v749_v8  ;;  %798 = vmatpush.bf16.msra.mxu3 %v752_v58 }
 0x214   :  { %v134_v63 = vsel %vm133_vm1, %v126_v12, %v132_v61 }
 0x215   :  { %136 = vst [vmem:[#allocation3] sm:$0xcc] %v134_v63  ;;  %v643_v0 = vsel %vm94_vm0, %v641_v62, %v642_v59 }
 0x216   :  { %v644_v18 = vsel %vm348_vm5, %v638_v53, %v643_v0 }
 0x217   :  { %646 = vst [vmem:[#allocation3 + $0x38] sm:$0xcc] %v644_v18  ;;  %v171_v32 = vpop.permute.xlu1 %170 }
 0x218   :  { %v173_v23 = vrot.slane %v171_v32, 4  ;;  %v208_v46 = vpop.permute.xlu2 %207 }
 0x219   :  { %v211_v36 = vrot.slane %v208_v46, 4 }
 0x21a   :  { %v344_v19 = vpop.permute.xlu0 %343 }
 0x21b   :  { %v346_v33 = vrot.slane %v344_v19, 4 }
 0x21c   :  { %v836_v40 = vld [vmem:[#allocation3] sm:$0xf]  ;;  %v874_v39 = vld [vmem:[#allocation3 + $0x4] sm:$0xf] }
 0x21d   :  { %v347_v44 = vsel %vm94_vm0, %v345_v1, %v346_v33 }
 0x21e   :  { %v349_v5 = vsel %vm348_vm5, %v342_v56, %v347_v44  ;;  %v881_v9 = vld [vmem:[#allocation3 + $0x34] sm:$0xf0]  ;;  %v862_v14 = vld [vmem:[#allocation3 + $0x38] sm:$0xf0] }
 0x21f   :  { %351 = vst [vmem:[#allocation3 + $0x30] sm:$0xcc] %v349_v5  ;;  %v861_v15 = vor.u32 %v881_v9, %v860_v4  ;;  %v865_v21 = vor.u32 %v879_v13, %v862_v14 }
 0x221   :  { %786 = vmatpush.bf16.msra.mxu2 %v861_v15  ;;  %799 = vmatpush.bf16.msra.mxu3 %v865_v21 }
 0x222   :  { %v169_v29 = vpop.permute.xlu0 %168 }
 0x223   :  { %v172_v7 = vrot.slane %v169_v29, 4 }
 0x225   :  { %v174_v26 = vsel %vm94_vm0, %v172_v7, %v173_v23  ;;  %787 = vmatpush.bf16.msra.mxu2 %v845_v24  ;;  %800 = vmatpush.bf16.msra.mxu3 %v849_v25 }
 0x226   :  { %v176_v30 = vsel %vm175_vm3, %v169_v29, %v174_v26  ;;  %v880_v31 = vld [vmem:[#allocation3 + $0x2c] sm:$0xf0]  ;;  %v854_v2 = vld [vmem:[#allocation3 + $0x30] sm:$0xf0] }
 0x227   :  { %178 = vst [vmem:[#allocation3 + $0x10] sm:$0x33] %v176_v30  ;;  %v853_v3 = vor.u32 %v880_v31, %v852_v27  ;;  %v857_v47 = vor.u32 %v878_v34, %v854_v2 }
 0x228   :  { %868 = vmatmul.msk.bf16.vlgmr.msra.gmra.mxu2 %vm737_vm6, %v676_v28  ;;  %869 = vmatmul.msk.bf16.vlgmr.msra.gmra.mxu3 %vm737_vm6, %v676_v28 }
 0x229   :  { %760 = vmatpush.bf16.msra.mxu0 %v853_v3  ;;  %773 = vmatpush.bf16.msra.mxu1 %v857_v47 }
 0x22a   :  { %v210_v35 = vpop.permute.xlu0 %209 }
 0x22b   :  { %v212_v10 = vrot.slane %v210_v35, 4 }
 0x22d   :  { %v213_v37 = vsel %vm94_vm0, %v211_v36, %v212_v10 }
 0x22e   :  { %v215_v38 = vsel %vm214_vm4, %v208_v46, %v213_v37 }
 0x22f   :  { %217 = vst [vmem:[#allocation3 + $0x10] sm:$0xcc] %v215_v38 }
 0x236   :  { %v876_v60 = vld [vmem:[#allocation3 + $0xc] sm:$0xf0]  ;;  %v838_v41 = vld [vmem:[#allocation3 + $0x10] sm:$0xf0] }
 0x237   :  { %v837_v57 = vor.u32 %v876_v60, %v836_v40  ;;  %v841_v42 = vor.u32 %v874_v39, %v838_v41 }
 0x239   :  { %761 = vmatpush.bf16.msra.mxu0 %v837_v57  ;;  %774 = vmatpush.bf16.msra.mxu1 %v841_v42 }
 0x23c   :  { %866 = vmatmul.msk.bf16.vlgmr.msra.gmra.mxu0 %vm737_vm6, %v676_v28  ;;  %867 = vmatmul.msk.bf16.vlgmr.msra.gmra.mxu1 %vm737_vm6, %v676_v28 }
 0x2ab   :  { %v789_v54 = vpop.f32.mrf.mxu2  ;;  %v802_v56 = vpop.f32.mrf.mxu3 }
 0x2ac   :  { %v818_v43 = vrot.slane %v789_v54, 4  ;;  %v819_v45 = vrot.slane %v802_v56, 4 }
 0x2ae   :  { %870 = vst [vmem:[%s1251_s5 + $0x20] sm:$0xf0] %v818_v43 }
 0x2af   :  { %872 = vst [vmem:[%s1251_s5 + $0x30] sm:$0xf] %v818_v43 }
 0x2b0   :  { %871 = vst [vmem:[%s1251_s5 + $0x28] sm:$0xf0] %v819_v45 }
 0x2b1   :  { %873 = vst [vmem:[%s1251_s5 + $0x38] sm:$0xf] %v819_v45 }
 0x2b3   :  { %v791_v17 = vpop.f32.mrf.mxu2  ;;  %v804_v11 = vpop.f32.mrf.mxu3 }
 0x2b9   :  { %v763_v50 = vpop.f32.mrf.mxu0  ;;  %v776_v12 = vpop.f32.mrf.mxu1 }
 0x2ba   :  { %v808_v6 = vrot.slane %v763_v50, 4  ;;  %v809_v48 = vrot.slane %v776_v12, 4 }
 0x2bc   :  { %812 = vst [vmem:[%s1251_s5] sm:$0xf0] %v808_v6 }
 0x2bd   :  { %814 = vst [vmem:[%s1251_s5 + $0x10] sm:$0xf] %v808_v6 }
 0x2be   :  { %813 = vst [vmem:[%s1251_s5 + $0x8] sm:$0xf0] %v809_v48 }
 0x2bf   :  { %815 = vst [vmem:[%s1251_s5 + $0x18] sm:$0xf] %v809_v48 }
 0x2c1   :  { %v765_v49 = vpop.f32.mrf.mxu0  ;;  %v778_v51 = vpop.f32.mrf.mxu1 }
 0x2c2   :  { %830 = vsyncpa [#allocation5], 1 }

</bundles_post_ra>
